<compile_context>
chip_gen: v7x
topology: tpu7x:2x2x1
jax: 0.10.0
libtpu: 0.0.40
codegen_flags: <defaults>
</compile_context>

<pallas_src>
import jax
import jax.numpy as jnp
from jax.experimental import pallas as pl
from jax.experimental.pallas import tpu as pltpu

# ---- static configuration (small, consistent with the module's forward) ----
NUM_ENCODERS = 3      # len(self.encoders)
BATCH        = 8      # per-call obs batch
D_IN         = 32     # obs feature dim
D_LATENT     = 16     # per-encoder latent dim  -> concat latent = 3 * 16 = 48
D_OUT        = 8      # decoder output dim
N_CALLS      = 4      # number of stacked forward invocations (flattened rows)
D_CAT        = NUM_ENCODERS * D_LATENT


def combine_net_kernel(obs_ref, enc_w_ref, enc_b_ref, dec_w_ref, dec_b_ref,
                       out_ref):
    """Fused forward: relu(obs @ W_enc_packed + b_enc) @ W_dec + b_dec.

    obs_ref:   (ROWS, D_IN)      -- all stacked calls flattened into rows
    enc_w_ref: (D_IN, D_CAT)     -- column-packed encoder weights
    enc_b_ref: (1, D_CAT)        -- packed encoder biases (lane-major row)
    dec_w_ref: (D_CAT, D_OUT)
    dec_b_ref: (1, D_OUT)
    out_ref:   (ROWS, D_OUT)
    """
    obs = obs_ref[...]                                        # (ROWS, D_IN) f32

    latent = jnp.maximum(
        jnp.dot(obs, enc_w_ref[...],
                preferred_element_type=jnp.float32) + enc_b_ref[...],
        0.0)                                                  # (ROWS, D_CAT)

    out = jnp.dot(latent, dec_w_ref[...],
                  preferred_element_type=jnp.float32) + dec_b_ref[...]
    out_ref[...] = out.astype(out_ref.dtype)                  # (ROWS, D_OUT)


def pack_params(enc_w, enc_b, dec_w, dec_b):
    """One-time parameter prep (do this when weights are created/loaded).

    Args:
      enc_w: (NUM_ENCODERS, D_IN, D_LATENT)
      enc_b: (NUM_ENCODERS, D_LATENT)
      dec_w: (D_CAT, D_OUT)
      dec_b: (D_OUT,)
    Returns packed arrays ready to feed the kernel every forward call.
    """
    # (N, D_IN, D_LAT) -> (D_IN, N, D_LAT) -> (D_IN, N*D_LAT); column order
    # matches torch.cat(latent, dim=-1) with encoder 0's latents first.
    enc_w_packed = jnp.transpose(enc_w, (1, 0, 2)).reshape(D_IN, D_CAT)
    enc_b_packed = enc_b.reshape(1, D_CAT)
    dec_b_row    = dec_b.reshape(1, D_OUT)
    return enc_w_packed, enc_b_packed, dec_w, dec_b_row


@jax.jit
def combine_net_forward(obs_stack, enc_w_packed, enc_b_packed, dec_w,
                        dec_b_row):
    """Fused CombineNet forward over a stack of observations.

    Args:
      obs_stack:    (N_CALLS, BATCH, D_IN)
      enc_w_packed: (D_IN, D_CAT)        -- from pack_params
      enc_b_packed: (1, D_CAT)
      dec_w:        (D_CAT, D_OUT)
      dec_b_row:    (1, D_OUT)
    Returns:
      (N_CALLS, BATCH, D_OUT)
    """
    n_calls, batch, d_in = obs_stack.shape
    rows = n_calls * batch

    # Collapse the calls into one row-batched matmul: single kernel launch,
    # single DMA per operand, no grid overhead.
    obs_flat = obs_stack.reshape(rows, d_in)

    vmem_full = pl.BlockSpec(memory_space=pltpu.MemorySpace.VMEM)

    out_flat = pl.pallas_call(
        combine_net_kernel,
        out_shape=jax.ShapeDtypeStruct((rows, D_OUT), jnp.float32),
        in_specs=[vmem_full] * 5,
        out_specs=vmem_full,
    )(obs_flat, enc_w_packed, enc_b_packed, dec_w, dec_b_row)

    return out_flat.reshape(n_calls, batch, D_OUT)


def _reference_forward(obs, enc_w, enc_b, dec_w, dec_b):
    """Pure-JAX reference mirroring PyTorch CombineNet.forward for one call."""
    latent = jnp.concatenate(
        [jnp.maximum(obs @ enc_w[i] + enc_b[i][None, :], 0.0)
         for i in range(NUM_ENCODERS)],
        axis=-1)
    return latent @ dec_w + dec_b[None, :]


if __name__ == "__main__":
    key = jax.random.PRNGKey(0)
    k_obs, k_ew, k_eb, k_dw, k_db = jax.random.split(key, 5)

    # deterministic synthetic parameters (shapes implied by the forward pass)
    obs_stack = jax.random.normal(k_obs, (N_CALLS, BATCH, D_IN),
                                  dtype=jnp.float32)
    enc_w = jax.random.normal(k_ew, (NUM_ENCODERS, D_IN, D_LATENT),
                              dtype=jnp.float32) * 0.1
    enc_b = jax.random.normal(k_eb, (NUM_ENCODERS, D_LATENT),
                              dtype=jnp.float32) * 0.1
    dec_w = jax.random.normal(k_dw, (D_CAT, D_OUT), dtype=jnp.float32) * 0.1
    dec_b = jax.random.normal(k_db, (D_OUT,), dtype=jnp.float32) * 0.1

    # One-time packing (hoisted out of the forward path).
    enc_w_p, enc_b_p, dec_w_p, dec_b_p = pack_params(enc_w, enc_b, dec_w, dec_b)
    enc_w_p, enc_b_p, dec_w_p, dec_b_p = jax.block_until_ready(
        (enc_w_p, enc_b_p, dec_w_p, dec_b_p))

    out = combine_net_forward(obs_stack, enc_w_p, enc_b_p, dec_w_p, dec_b_p)
    out = jax.block_until_ready(out)
    assert out.shape == (N_CALLS, BATCH, D_OUT)

    # Check every stacked call against the unfused reference.
    for n in range(N_CALLS):
        ref_n = _reference_forward(obs_stack[n], enc_w, enc_b, dec_w, dec_b)
        assert jnp.allclose(out[n], ref_n, atol=1e-5, rtol=1e-5)

    # TODO(synk): `no_gradient=True` (torch.no_grad on encoders[1:]) only
    # affects backward; a custom_vjp would be needed if this is differentiated.

    print("KERNEL_OK")
</pallas_src>

<mosaic_0001>
module attributes {stable_mosaic.version = 11 : i64} {
  func.func @combine_net_kernel(%arg0: memref<32x32xf32, #tpu.memory_space<vmem>>, %arg1: memref<32x48xf32, #tpu.memory_space<vmem>>, %arg2: memref<1x48xf32, #tpu.memory_space<vmem>>, %arg3: memref<48x8xf32, #tpu.memory_space<vmem>>, %arg4: memref<1x8xf32, #tpu.memory_space<vmem>>, %arg5: memref<32x8xf32, #tpu.memory_space<vmem>>) attributes {dimension_semantics = [], scalar_prefetch = 0 : i64, scratch_operands = 0 : i64, tpu.core_type = #tpu.core_type<tc>} {
    %c0 = arith.constant 0 : index
    %c0_0 = arith.constant 0 : index
    %0 = vector.load %arg0[%c0, %c0_0] : memref<32x32xf32, #tpu.memory_space<vmem>>, vector<32x32xf32>
    %c0_1 = arith.constant 0 : index
    %c0_2 = arith.constant 0 : index
    %1 = vector.load %arg1[%c0_1, %c0_2] : memref<32x48xf32, #tpu.memory_space<vmem>>, vector<32x48xf32>
    %cst = arith.constant dense<0.000000e+00> : vector<32x48xf32>
    %2 = tpu.matmul %0, %1, %cst {dimension_numbers = #tpu.dot_dimension_numbers<[1], [0], [0], [1], [0, 0, 1, 1], [], []>} : vector<32x32xf32>, vector<32x48xf32>, vector<32x48xf32> -> vector<32x48xf32>
    %c0_3 = arith.constant 0 : index
    %c0_4 = arith.constant 0 : index
    %3 = vector.load %arg2[%c0_3, %c0_4] : memref<1x48xf32, #tpu.memory_space<vmem>>, vector<1x48xf32>
    %4 = vector.broadcast %3 : vector<1x48xf32> to vector<32x48xf32>
    %5 = arith.addf %2, %4 : vector<32x48xf32>
    %cst_5 = arith.constant 0.000000e+00 : f32
    %6 = vector.broadcast %cst_5 : f32 to vector<32x48xf32>
    %7 = arith.maximumf %5, %6 : vector<32x48xf32>
    %c0_6 = arith.constant 0 : index
    %c0_7 = arith.constant 0 : index
    %8 = vector.load %arg3[%c0_6, %c0_7] : memref<48x8xf32, #tpu.memory_space<vmem>>, vector<48x8xf32>
    %cst_8 = arith.constant dense<0.000000e+00> : vector<32x8xf32>
    %9 = tpu.matmul %7, %8, %cst_8 {dimension_numbers = #tpu.dot_dimension_numbers<[1], [0], [0], [1], [0, 0, 1, 1], [], []>} : vector<32x48xf32>, vector<48x8xf32>, vector<32x8xf32> -> vector<32x8xf32>
    %c0_9 = arith.constant 0 : index
    %c0_10 = arith.constant 0 : index
    %10 = vector.load %arg4[%c0_9, %c0_10] : memref<1x8xf32, #tpu.memory_space<vmem>>, vector<1x8xf32>
    %11 = vector.broadcast %10 : vector<1x8xf32> to vector<32x8xf32>
    %12 = arith.addf %9, %11 : vector<32x8xf32>
    %c0_11 = arith.constant 0 : index
    %c0_12 = arith.constant 0 : index
    %13 = vector.load %arg5[%c0_11, %c0_12] : memref<32x8xf32, #tpu.memory_space<vmem>>, vector<32x8xf32>
    tpu.vector_store %arg5[%c0_11, %c0_12], %12 {strides = array<i32>} : memref<32x8xf32, #tpu.memory_space<vmem>>, vector<32x8xf32>,
    return
  }
}

</mosaic_0001>

<bundles_post_ra>
// kernel: combine_net_forward.1
= control target key start
LH: loop header
LB: loop body
LE: loop exit
PB: predicated region body
PF: predicated region fallthrough
CT: control target
= control target key end

     0   :  { %10 = vsyncpa [#allocation3], 0  ;;  %s521_s0 = inlined_call_operand.vmem [shape: f32[32,32], index: 0, kind: input, shape index: {}]   ;;  %s522_s1 = inlined_call_operand.hbm [shape: f32[32,48], index: 1, kind: input, shape index: {}]   ;;  %s523_s2 = inlined_call_operand.vmem [shape: f32[1,48], index: 2, kind: input, shape index: {}]   ;;  %s524_s3 = inlined_call_operand.vmem [shape: f32[48,8], index: 3, kind: input, shape index: {}]   ;;  %s525_s4 = inlined_call_operand.vmem [shape: f32[1,8], index: 4, kind: input, shape index: {}]   ;;  %s526_s5 = inlined_call_operand.hbm [shape: f32[32,8], index: 5, kind: output, shape index: {}]  }
   0x1   :  { %11 = vsyncpa [#allocation4], 0  ;;  %s417_s18 = smov [#allocation2]   ;;  %s369_s22 = scalar_lea.hbm %s522_s1, 512 }
   0x2   :  { %s19_s19 = sshll.u32 %s417_s18, 4  ;;  %p370_p0 = scmp.ne.s32.totalorder %s522_s1, %s369_s22  ;;  %s20_s19 = int_to_ptr.vmem [resolvable:$true] %s19_s19 }
   0x3   :  { %p373_p1 = scmp.lt.u32.totalorder %s369_s22, %s522_s1 }
   0x5   :  { %p375_p2 = pnand %p373_p1, %p370_p0 }
   0x7   :  { %378 = shalt.err (!%p375_p2)
}
   0x8   :  { %s379_s27 = scalar_lea.vmem %s20_s19, 512  ;;  %p384_p4 = scmp.lt.s32.totalorder %s20_s19, %s20_s19 }
   0x9   :  { %p380_p3 = scmp.ne.s32.totalorder %s20_s19, %s379_s27  ;;  %p385_p5 = scmp.lt.s32.totalorder %s379_s27, %s379_s27 }
   0xb   :  { %p386_p6 = por %p385_p5, %p384_p4 }
   0xd   :  { %p387_p7 = pnand %p386_p6, %p380_p3 }
   0xf   :  { %390 = shalt.err (!%p387_p7)
}
  0x10   :  { %s418_s28 = smov 128   ;;  %s419_s29 = smov 8  }
  0x11   :  { %25 = dma.hbm_to_vmem [thread:$0]  %s522_s1, 512, %s20_s19, [#allocation3], %s418_s28, %s418_s28, %s419_s29  }
  0x12   :  { %413 = dma.done.wait [#allocation3], 512  }
  0x13   :  { %414 = vsyncadd [#allocation3], 4294966784  ;;  %vm50_vm0 = vcmask 261120   ;;  %v39_v0 = vld [vmem:[#allocation2] sm:$0xff]  ;;  %v40_v1 = vld [vmem:[#allocation2 + $0x8] sm:$0xff]  ;;  %vm165_vm1 = vcmask 392192  }
  0x14   :  { %v41_v2 = vld [vmem:[#allocation2 + $0x10] sm:$0xff]  ;;  %v345_v3 = vpack.c.bf16 %v40_v1, %v39_v0  ;;  %v42_v4 = vld [vmem:[#allocation2 + $0x18] sm:$0xff]  ;;  %v35_v5 = vld [vmem:[%s521_s0] sm:$0xff]  ;;  %vm263_vm2 = vcmask 64512  }
  0x15   :  { %v349_v6 = vpack.c.bf16 %v42_v4, %v41_v2  ;;  %321 = vmatprep.mubr.msk.f32.mxu0 %vm50_vm0, %v35_v5  ;;  %v152_v7 = vld [vmem:[%s524_s3] sm:$0xff]  ;;  %v153_v8 = vld [vmem:[%s524_s3 + $0x8] sm:$0xff]  ;;  %v154_v9 = vld [vmem:[%s524_s3 + $0x10] sm:$0xff] }
  0x16   :  { %346 = vmatprep.subr.bf16.mxu0 %v345_v3  ;;  %v155_v10 = vld [vmem:[%s524_s3 + $0x18] sm:$0xff]  ;;  %v353_v11 = vpack.c.bf16 %v153_v8, %v152_v7  ;;  %v36_v13 = vld [vmem:[%s521_s0 + $0x8] sm:$0xff]  ;;  %v37_v14 = vld [vmem:[%s521_s0 + $0x10] sm:$0xff] }
  0x17   :  { %348 = vmatpush3.bf16.msra.mxu0 %v345_v3  ;;  %v357_v12 = vpack.c.bf16 %v155_v10, %v154_v9  ;;  %v38_v15 = vld [vmem:[%s521_s0 + $0x18] sm:$0xff]  ;;  %v156_v16 = vld [vmem:[%s524_s3 + $0x20] sm:$0xff]  ;;  %v157_v17 = vld [vmem:[%s524_s3 + $0x28] sm:$0xff] }
  0x18   :  { %350 = vmatprep.subr.bf16.mxu0 %v349_v6  ;;  %354 = vmatprep.subr.bf16.mxu1 %v353_v11  ;;  %v361_v18 = vpack.c.bf16 %v157_v17, %v156_v16  ;;  %v285_v19 = vld [vmem:[%s523_s2] ss:$0 sm:$0xff]  ;;  %s420_s2 = smov [#allocation5]  }
  0x19   :  { %356 = vmatpush3.bf16.msra.mxu1 %v353_v11  ;;  %v290_v32 = vld [vmem:[%s525_s4] ss:$0 sm:$0xff]  ;;  %s273_s30 = sshll.u32 %s420_s2, 4  ;;  %s274_s30 = int_to_ptr.vmem [resolvable:$true] %s273_s30 }
  0x1a   :  { %358 = vmatprep.subr.bf16.mxu1 %v357_v12  ;;  %s391_s6 = scalar_lea.vmem %s274_s30, 512  ;;  %p396_p9 = scmp.lt.s32.totalorder %s274_s30, %s274_s30 }
  0x1b   :  { %352 = vmatpush3.bf16.msra.mxu0 %v349_v6  ;;  %p392_p8 = scmp.ne.s32.totalorder %s274_s30, %s391_s6  ;;  %p397_p10 = scmp.lt.s32.totalorder %s391_s6, %s391_s6 }
  0x1d   :  { %360 = vmatpush3.bf16.msra.mxu1 %v357_v12  ;;  %p398_p11 = por %p397_p10, %p396_p9 }
  0x1e   :  { %322 = vmatmul.mubr.msk.f32.vlgmr.msra.gmra.mrb[0].mxu0 %vm50_vm0, %v36_v13  ;;  %362 = vmatprep.subr.bf16.mxu1 %v361_v18 }
  0x1f   :  { %324 = vmatprep.mubr.msk.f32.mxu0 %vm50_vm0, %v37_v14  ;;  %p399_p12 = pnand %p398_p11, %p392_p8 }
  0x21   :  { %364 = vmatpush3.bf16.msra.mxu1 %v361_v18 }
  0x22   :  { %325 = vmatmul.mubr.msk.f32.gmra.mrb[2].mxu0 %vm50_vm0, %v38_v15 }
  0xf1   :  { %v323_v20 = vpop.f32.mrb[0].mxu0 }
  0xf2   :  { %v135_v21 = vadd.f32 %v323_v20, %v285_v19  ;;  %v129_v22 = vpop.f32.mrb[1].mxu0 }
  0xf3   :  { %v130_v23 = vadd.f32 %v285_v19, %v129_v22 }
  0xf4   :  { %v149_v26 = vmax.f32 %v135_v21, 0.0 }
  0xf5   :  { %v148_v24 = vmax.f32 %v130_v23, 0.0  ;;  %v326_v25 = vpop.f32.mrb[2].mxu0 }
  0xf6   :  { %v145_v27 = vadd.f32 %v326_v25, %v285_v19  ;;  %v139_v28 = vpop.f32.mrb[3].mxu0 }
  0xf7   :  { %v140_v29 = vadd.f32 %v285_v19, %v139_v28  ;;  %339 = vmatprep.mubr.msk.f32.mxu1 %vm165_vm1, %v148_v24 }
  0xf8   :  { %340 = vmatmul.mubr.msk.f32.vlgmr.msra.gmra.mrb[0].mxu1 %vm165_vm1, %v149_v26  ;;  %v151_v31 = vmax.f32 %v145_v27, 0.0 }
  0xf9   :  { %v150_v30 = vmax.f32 %v140_v29, 0.0 }
  0xfb   :  { %342 = vmatprep.mubr.msk.f32.mxu1 %vm165_vm1, %v150_v30 }
  0xfc   :  { %343 = vmatmul.mubr.msk.f32.gmra.mrb[2].mxu1 %vm165_vm1, %v151_v31 }
 0x1cb   :  { %v341_v33 = vpop.f32.mrb[0].mxu1 }
 0x1cc   :  { %v250_v34 = vadd.f32 %v341_v33, %v290_v32  ;;  %v244_v35 = vpop.f32.mrb[1].mxu1 }
 0x1cd   :  { %v245_v36 = vadd.f32 %v290_v32, %v244_v35 }
 0x1ce   :  { %265 = vst.msk [vmem:[#allocation5 + $0x8] sm:$0xff] %vm263_vm2, %v250_v34 }
 0x1cf   :  { %264 = vst.msk [vmem:[#allocation5] sm:$0xff] %vm263_vm2, %v245_v36  ;;  %v344_v37 = vpop.f32.mrb[2].mxu1 }
 0x1d0   :  { %v260_v38 = vadd.f32 %v344_v37, %v290_v32  ;;  %v254_v39 = vpop.f32.mrb[3].mxu1 }
 0x1d1   :  { %v255_v40 = vadd.f32 %v290_v32, %v254_v39 }
 0x1d2   :  { %267 = vst.msk [vmem:[#allocation5 + $0x18] sm:$0xff] %vm263_vm2, %v260_v38 }
 0x1d3   :  { %266 = vst.msk [vmem:[#allocation5 + $0x10] sm:$0xff] %vm263_vm2, %v255_v40 }
 0x1d4   :  { %402 = shalt.err (!%p399_p12)
}
 0x1d5   :  { %s403_s8 = scalar_lea.hbm %s526_s5, 512 }
 0x1d6   :  { %p404_p13 = scmp.ne.s32.totalorder %s526_s5, %s403_s8  ;;  %p407_p0 = scmp.lt.u32.totalorder %s403_s8, %s526_s5 }
 0x1d8   :  { %p409_p1 = pnand %p407_p0, %p404_p13 }
 0x1da   :  { %412 = shalt.err (!%p409_p1)
}
 0x1db   :  { %279 = dma.vmem_to_hbm [thread:$0]  %s274_s30, 512, %s526_s5, [#allocation4], %s418_s28, %s418_s28, %s419_s29  }
 0x1dc   :  { %415 = dma.done.wait [#allocation4], 512  }
 0x1dd   :  { %416 = vsyncadd [#allocation4], 4294966784 }
 0x1de   :  { %283 = vsyncpa [#allocation3], 1 }
 0x1df   :  { %284 = vsyncpa [#allocation4], 1 }

</bundles_post_ra>
